<compile_context>
chip_gen: v5e
topology: v5e:2x2
jax: 0.10.0
libtpu: 0.0.40
codegen_flags: <defaults>
</compile_context>

<pallas_src>
import jax
import jax.numpy as jnp
from jax.experimental import pallas as pl
from jax.experimental.pallas import tpu as pltpu

INPUT_SIZE = 71
HIDDEN = (256, 128, 64)
BN_EPS = 1e-5

H3_PAD = 128             # layer-3 / head-K width, padded 64 -> 128 lanes
HEAD_PAD = 128           # fused-head output width (lane-dense N)
N_HEAD = 7 + 2 + 1 + 1   # gear, brake, accel, steer columns


def _pick_tm(B, block_m):
    """Batch tile size: multiple of 16 when possible, >=2 grid steps for v7x."""
    if B % 16 == 0:
        gran = 16
    elif B % 8 == 0:
        gran = 8
    else:
        # TODO(synk): misaligned batch -> single full-batch block (block dim ==
        # array dim satisfies the layout rule); tile via minimal pad only if a
        # huge misaligned batch ever matters.
        return B
    tm = min(block_m, B)
    tm = max(gran, (tm // gran) * gran)
    # Guarantee >=2 grid steps on mid-size batches so both v7x TensorCores work.
    if B // tm < 2 and B >= 2 * gran:
        tm = max(gran, ((B // 2) // gran) * gran)
    return tm


def torcs_mlp_kernel(x_ref,
                     w1_ref, b1_ref,
                     w2_ref, b2_ref,
                     w3_ref, b3_ref,
                     wh_ref, bh_ref,
                     out_ref):
    """One batch tile: 3x (Linear+ReLU with BN pre-folded) + fused head dot."""

    def layer(h, w_ref, b_ref):
        z = jnp.dot(h, w_ref[...], preferred_element_type=jnp.float32) + b_ref[...]
        return jnp.maximum(z, 0.0).astype(jnp.bfloat16)

    h = x_ref[...].astype(jnp.bfloat16)   # (TM, 71): in-kernel cast, K=71 dot
    h = layer(h, w1_ref, b1_ref)          # (TM, 256)
    h = layer(h, w2_ref, b2_ref)          # (TM, 128)
    h = layer(h, w3_ref, b3_ref)          # (TM, 128)  (cols 64..127 are zero)

    # Fused heads: one lane-dense dot.  Per-column sigmoid/tanh happen in the
    # wrapper on the sliced columns (avoids full-tile EUP transcendentals).
    z = jnp.dot(h, wh_ref[...], preferred_element_type=jnp.float32) + bh_ref[...]
    out_ref[...] = z.astype(jnp.bfloat16)
    # TODO(synk): Dropout(0.3) is identity in eval mode; no stochastic mask here.


def torcs_mlp_forward(x, params, *, block_m=1024):
    """x: (B, 71) f32. params: raw PyTorch-style params (see init_params)."""
    (w1, b1, g1, be1, m1, v1,
     w2, b2, g2, be2, m2, v2,
     w3, b3, g3, be3, m3, v3,
     wg, bg, wb, bb, wa, ba, ws, bs) = params

    def bn_affine(g, be, m, v):
        s = g * jax.lax.rsqrt(v + BN_EPS)
        return s, be - m * s

    s1, t1 = bn_affine(g1, be1, m1, v1)
    s2, t2 = bn_affine(g2, be2, m2, v2)
    s3, t3 = bn_affine(g3, be3, m3, v3)

    # Fold BN(k) forward into Linear(k+1):  (a*s + t) @ W + b = a @ (s*W) + (t@W + b)
    w2f = s1.reshape(-1, 1) * w2
    b2f = b2 + t1 @ w2
    w3f = s2.reshape(-1, 1) * w3          # (128, 64)
    b3f = b3 + t2 @ w3                    # (1, 64)

    # Pad layer-3 output width 64 -> 128 (zero columns) so h3 is lane-dense.
    w3p = jnp.pad(w3f, ((0, 0), (0, H3_PAD - HIDDEN[2])))   # (128, 128)
    b3p = jnp.pad(b3f, ((0, 0), (0, H3_PAD - HIDDEN[2])))   # (1, 128)

    # Fuse the four heads into one (64, 128) weight, fold BN3 into it, then
    # pad K 64 -> 128 with zero rows to match the padded h3.
    wh = jnp.concatenate([wg, wb, wa, ws], axis=1)           # (64, 11)
    bh = jnp.concatenate([bg, bb, ba, bs], axis=1)           # (1, 11)
    wh = jnp.pad(wh, ((0, 0), (0, HEAD_PAD - N_HEAD)))       # (64, 128)
    bh = jnp.pad(bh, ((0, 0), (0, HEAD_PAD - N_HEAD)))       # (1, 128)
    whf = s3.reshape(-1, 1) * wh
    bhf = bh + t3 @ wh
    whp = jnp.pad(whf, ((0, H3_PAD - HIDDEN[2]), (0, 0)))    # (128, 128)

    B, F = x.shape
    assert F == INPUT_SIZE

    tm = _pick_tm(B, block_m)
    grid_m = pl.cdiv(B, tm)   # last block may be partial; wrapper slices [:B]

    weights = [w.astype(jnp.bfloat16) for w in (w1, w2f, w3p, whp)]
    biases = [b1, b2f, b3p, bhf]   # f32, each (1, N)

    def const_spec(arr):
        return pl.BlockSpec(arr.shape, lambda i: (0, 0))

    in_specs = [pl.BlockSpec((tm, INPUT_SIZE), lambda i: (i, 0))]
    flat_args = [x]
    for w, b in zip(weights, biases):
        in_specs += [const_spec(w), const_spec(b)]
        flat_args += [w, b]

    out = pl.pallas_call(
        torcs_mlp_kernel,
        out_shape=jax.ShapeDtypeStruct((B, HEAD_PAD), jnp.bfloat16),
        grid=(grid_m,),
        in_specs=in_specs,
        out_specs=pl.BlockSpec((tm, HEAD_PAD), lambda i: (i, 0)),
        compiler_params=pltpu.CompilerParams(
            dimension_semantics=("parallel",)),
    )(*flat_args)

    out_f32 = out[:B].astype(jnp.float32)
    gear = out_f32[:, 0:7]
    brake = out_f32[:, 7:9]
    accel = jax.nn.sigmoid(out_f32[:, 9:10])
    steer = jnp.tanh(out_f32[:, 10:11])
    return gear, brake, accel, steer


def torcs_mlp_reference(x, params):
    """Pure-JAX f32 reference (eval mode) for correctness checking."""
    (w1, b1, g1, be1, m1, v1,
     w2, b2, g2, be2, m2, v2,
     w3, b3, g3, be3, m3, v3,
     wg, bg, wb, bb, wa, ba, ws, bs) = params

    def block(h, w, b, g, be, m, v):
        y = jnp.maximum(h @ w + b, 0.0)
        return (y - m) * (g * jax.lax.rsqrt(v + BN_EPS)) + be

    h = block(x, w1, b1, g1, be1, m1, v1)
    h = block(h, w2, b2, g2, be2, m2, v2)
    h = block(h, w3, b3, g3, be3, m3, v3)
    return (h @ wg + bg, h @ wb + bb,
            jax.nn.sigmoid(h @ wa + ba), jnp.tanh(h @ ws + bs))


def init_params(key):
    """Deterministic params mimicking PyTorch defaults (eval-mode BN stats)."""
    params = []
    keys = iter(jax.random.split(key, 64))

    def linear(in_f, out_f):
        bound = 1.0 / jnp.sqrt(jnp.float32(in_f))
        w = jax.random.uniform(next(keys), (in_f, out_f), jnp.float32, -bound, bound)
        b = jax.random.uniform(next(keys), (1, out_f), jnp.float32, -bound, bound)
        return w, b

    def bn(feat):
        gamma = jnp.ones((1, feat), jnp.float32)
        beta = jnp.zeros((1, feat), jnp.float32)
        mean = 0.1 * jax.random.normal(next(keys), (1, feat), jnp.float32)
        var = jax.random.uniform(next(keys), (1, feat), jnp.float32, 0.5, 1.5)
        return gamma, beta, mean, var

    dims = [INPUT_SIZE] + list(HIDDEN)
    for i in range(3):
        w, b = linear(dims[i], dims[i + 1])
        g, be, m, v = bn(dims[i + 1])
        params += [w, b, g, be, m, v]

    for out_f in (7, 2, 1, 1):  # gear, brake, accel, steer heads
        w, b = linear(HIDDEN[-1], out_f)
        params += [w, b]

    return tuple(params)


if __name__ == "__main__":
    key = jax.random.PRNGKey(0)
    k_params, k_x = jax.random.split(key)

    B = 64
    x = jax.random.normal(k_x, (B, INPUT_SIZE), jnp.float32)
    params = init_params(k_params)

    gear, brake, accel, steer = torcs_mlp_forward(x, params)
    jax.block_until_ready((gear, brake, accel, steer))

    assert gear.shape == (B, 7)
    assert brake.shape == (B, 2)
    assert accel.shape == (B, 1)
    assert steer.shape == (B, 1)

    # Loose numerical check vs f32 reference (kernel uses bf16 matmul inputs
    # and bf16 output storage).
    rg, rb, ra, rs = torcs_mlp_reference(x, params)
    max_err = max(float(jnp.max(jnp.abs(a - b)))
                  for a, b in ((gear, rg), (brake, rb), (accel, ra), (steer, rs)))
    assert max_err < 0.1, f"max abs error vs reference too large: {max_err}"

    print("KERNEL_OK")
</pallas_src>

<mosaic_0001>
module attributes {stable_mosaic.version = 11 : i64} {
  func.func @torcs_mlp_kernel(%arg0: i32, %arg1: memref<32x71xf32, #tpu.memory_space<vmem>>, %arg2: memref<71x256xbf16, #tpu.memory_space<vmem>>, %arg3: memref<1x256xf32, #tpu.memory_space<vmem>>, %arg4: memref<256x128xbf16, #tpu.memory_space<vmem>>, %arg5: memref<1x128xf32, #tpu.memory_space<vmem>>, %arg6: memref<128x128xbf16, #tpu.memory_space<vmem>>, %arg7: memref<1x128xf32, #tpu.memory_space<vmem>>, %arg8: memref<128x128xbf16, #tpu.memory_space<vmem>>, %arg9: memref<1x128xf32, #tpu.memory_space<vmem>>, %arg10: memref<32x128xbf16, #tpu.memory_space<vmem>>) attributes {dimension_semantics = [#tpu.dimension_semantics<parallel>], iteration_bounds = array<i64: 2>, scalar_prefetch = 0 : i64, scratch_operands = 0 : i64, tpu.core_type = #tpu.core_type<tc>, window_params = [{transform_indices = @transform_0, window_bounds = array<i64: 32, 71>}, {pipeline_mode = #tpu.pipeline_mode<synchronous>, transform_indices = @transform_1, window_bounds = array<i64: 71, 256>}, {pipeline_mode = #tpu.pipeline_mode<synchronous>, transform_indices = @transform_2, window_bounds = array<i64: 1, 256>}, {pipeline_mode = #tpu.pipeline_mode<synchronous>, transform_indices = @transform_3, window_bounds = array<i64: 256, 128>}, {pipeline_mode = #tpu.pipeline_mode<synchronous>, transform_indices = @transform_4, window_bounds = array<i64: 1, 128>}, {pipeline_mode = #tpu.pipeline_mode<synchronous>, transform_indices = @transform_5, window_bounds = array<i64: 128, 128>}, {pipeline_mode = #tpu.pipeline_mode<synchronous>, transform_indices = @transform_6, window_bounds = array<i64: 1, 128>}, {pipeline_mode = #tpu.pipeline_mode<synchronous>, transform_indices = @transform_7, window_bounds = array<i64: 128, 128>}, {pipeline_mode = #tpu.pipeline_mode<synchronous>, transform_indices = @transform_8, window_bounds = array<i64: 1, 128>}, {transform_indices = @transform_9, window_bounds = array<i64: 32, 128>}]} {
    %c0 = arith.constant 0 : index
    %c0_0 = arith.constant 0 : index
    %0 = vector.load %arg1[%c0, %c0_0] : memref<32x71xf32, #tpu.memory_space<vmem>>, vector<32x71xf32>
    %1 = arith.truncf %0 : vector<32x71xf32> to vector<32x71xbf16>
    %c0_1 = arith.constant 0 : index
    %c0_2 = arith.constant 0 : index
    %2 = vector.load %arg2[%c0_1, %c0_2] : memref<71x256xbf16, #tpu.memory_space<vmem>>, vector<71x256xbf16>
    %cst = arith.constant dense<0.000000e+00> : vector<32x256xf32>
    %3 = tpu.matmul %1, %2, %cst {dimension_numbers = #tpu.dot_dimension_numbers<[1], [0], [0], [1], [0, 0, 1, 1], [], []>} : vector<32x71xbf16>, vector<71x256xbf16>, vector<32x256xf32> -> vector<32x256xf32>
    %c0_3 = arith.constant 0 : index
    %c0_4 = arith.constant 0 : index
    %4 = vector.load %arg3[%c0_3, %c0_4] : memref<1x256xf32, #tpu.memory_space<vmem>>, vector<1x256xf32>
    %5 = vector.broadcast %4 : vector<1x256xf32> to vector<32x256xf32>
    %6 = arith.addf %3, %5 : vector<32x256xf32>
    %cst_5 = arith.constant 0.000000e+00 : f32
    %7 = vector.broadcast %cst_5 : f32 to vector<32x256xf32>
    %8 = arith.maximumf %6, %7 : vector<32x256xf32>
    %9 = arith.truncf %8 : vector<32x256xf32> to vector<32x256xbf16>
    %c0_6 = arith.constant 0 : index
    %c0_7 = arith.constant 0 : index
    %10 = vector.load %arg4[%c0_6, %c0_7] : memref<256x128xbf16, #tpu.memory_space<vmem>>, vector<256x128xbf16>
    %cst_8 = arith.constant dense<0.000000e+00> : vector<32x128xf32>
    %11 = tpu.matmul %9, %10, %cst_8 {dimension_numbers = #tpu.dot_dimension_numbers<[1], [0], [0], [1], [0, 0, 1, 1], [], []>} : vector<32x256xbf16>, vector<256x128xbf16>, vector<32x128xf32> -> vector<32x128xf32>
    %c0_9 = arith.constant 0 : index
    %c0_10 = arith.constant 0 : index
    %12 = vector.load %arg5[%c0_9, %c0_10] : memref<1x128xf32, #tpu.memory_space<vmem>>, vector<1x128xf32>
    %13 = vector.broadcast %12 : vector<1x128xf32> to vector<32x128xf32>
    %14 = arith.addf %11, %13 : vector<32x128xf32>
    %cst_11 = arith.constant 0.000000e+00 : f32
    %15 = vector.broadcast %cst_11 : f32 to vector<32x128xf32>
    %16 = arith.maximumf %14, %15 : vector<32x128xf32>
    %17 = arith.truncf %16 : vector<32x128xf32> to vector<32x128xbf16>
    %c0_12 = arith.constant 0 : index
    %c0_13 = arith.constant 0 : index
    %18 = vector.load %arg6[%c0_12, %c0_13] : memref<128x128xbf16, #tpu.memory_space<vmem>>, vector<128x128xbf16>
    %cst_14 = arith.constant dense<0.000000e+00> : vector<32x128xf32>
    %19 = tpu.matmul %17, %18, %cst_14 {dimension_numbers = #tpu.dot_dimension_numbers<[1], [0], [0], [1], [0, 0, 1, 1], [], []>} : vector<32x128xbf16>, vector<128x128xbf16>, vector<32x128xf32> -> vector<32x128xf32>
    %c0_15 = arith.constant 0 : index
    %c0_16 = arith.constant 0 : index
    %20 = vector.load %arg7[%c0_15, %c0_16] : memref<1x128xf32, #tpu.memory_space<vmem>>, vector<1x128xf32>
    %21 = vector.broadcast %20 : vector<1x128xf32> to vector<32x128xf32>
    %22 = arith.addf %19, %21 : vector<32x128xf32>
    %cst_17 = arith.constant 0.000000e+00 : f32
    %23 = vector.broadcast %cst_17 : f32 to vector<32x128xf32>
    %24 = arith.maximumf %22, %23 : vector<32x128xf32>
    %25 = arith.truncf %24 : vector<32x128xf32> to vector<32x128xbf16>
    %c0_18 = arith.constant 0 : index
    %c0_19 = arith.constant 0 : index
    %26 = vector.load %arg8[%c0_18, %c0_19] : memref<128x128xbf16, #tpu.memory_space<vmem>>, vector<128x128xbf16>
    %cst_20 = arith.constant dense<0.000000e+00> : vector<32x128xf32>
    %27 = tpu.matmul %25, %26, %cst_20 {dimension_numbers = #tpu.dot_dimension_numbers<[1], [0], [0], [1], [0, 0, 1, 1], [], []>} : vector<32x128xbf16>, vector<128x128xbf16>, vector<32x128xf32> -> vector<32x128xf32>
    %c0_21 = arith.constant 0 : index
    %c0_22 = arith.constant 0 : index
    %28 = vector.load %arg9[%c0_21, %c0_22] : memref<1x128xf32, #tpu.memory_space<vmem>>, vector<1x128xf32>
    %29 = vector.broadcast %28 : vector<1x128xf32> to vector<32x128xf32>
    %30 = arith.addf %27, %29 : vector<32x128xf32>
    %31 = arith.truncf %30 : vector<32x128xf32> to vector<32x128xbf16>
    %c0_23 = arith.constant 0 : index
    %c0_24 = arith.constant 0 : index
    %32 = vector.load %arg10[%c0_23, %c0_24] : memref<32x128xbf16, #tpu.memory_space<vmem>>, vector<32x128xbf16>
    tpu.vector_store %arg10[%c0_23, %c0_24], %31 {strides = array<i32>} : memref<32x128xbf16, #tpu.memory_space<vmem>>, vector<32x128xbf16>,
    return
  }
  func.func @transform_0(%arg0: i32) -> (i32, i32) {
    %c0_i32 = arith.constant 0 : i32
    %c0_i32_0 = arith.constant 0 : i32
    return %arg0, %c0_i32 : i32, i32
  }
  func.func @transform_1(%arg0: i32) -> (i32, i32) {
    %c0_i32 = arith.constant 0 : i32
    %c0_i32_0 = arith.constant 0 : i32
    %c0_i32_1 = arith.constant 0 : i32
    return %c0_i32, %c0_i32_0 : i32, i32
  }
  func.func @transform_2(%arg0: i32) -> (i32, i32) {
    %c0_i32 = arith.constant 0 : i32
    %c0_i32_0 = arith.constant 0 : i32
    %c0_i32_1 = arith.constant 0 : i32
    return %c0_i32, %c0_i32_0 : i32, i32
  }
  func.func @transform_3(%arg0: i32) -> (i32, i32) {
    %c0_i32 = arith.constant 0 : i32
    %c0_i32_0 = arith.constant 0 : i32
    %c0_i32_1 = arith.constant 0 : i32
    return %c0_i32, %c0_i32_0 : i32, i32
  }
  func.func @transform_4(%arg0: i32) -> (i32, i32) {
    %c0_i32 = arith.constant 0 : i32
    %c0_i32_0 = arith.constant 0 : i32
    %c0_i32_1 = arith.constant 0 : i32
    return %c0_i32, %c0_i32_0 : i32, i32
  }
  func.func @transform_5(%arg0: i32) -> (i32, i32) {
    %c0_i32 = arith.constant 0 : i32
    %c0_i32_0 = arith.constant 0 : i32
    %c0_i32_1 = arith.constant 0 : i32
    return %c0_i32, %c0_i32_0 : i32, i32
  }
  func.func @transform_6(%arg0: i32) -> (i32, i32) {
    %c0_i32 = arith.constant 0 : i32
    %c0_i32_0 = arith.constant 0 : i32
    %c0_i32_1 = arith.constant 0 : i32
    return %c0_i32, %c0_i32_0 : i32, i32
  }
  func.func @transform_7(%arg0: i32) -> (i32, i32) {
    %c0_i32 = arith.constant 0 : i32
    %c0_i32_0 = arith.constant 0 : i32
    %c0_i32_1 = arith.constant 0 : i32
    return %c0_i32, %c0_i32_0 : i32, i32
  }
  func.func @transform_8(%arg0: i32) -> (i32, i32) {
    %c0_i32 = arith.constant 0 : i32
    %c0_i32_0 = arith.constant 0 : i32
    %c0_i32_1 = arith.constant 0 : i32
    return %c0_i32, %c0_i32_0 : i32, i32
  }
  func.func @transform_9(%arg0: i32) -> (i32, i32) {
    %c0_i32 = arith.constant 0 : i32
    %c0_i32_0 = arith.constant 0 : i32
    return %arg0, %c0_i32 : i32, i32
  }
}

</mosaic_0001>

<bundles_post_ra>
// kernel: tpu_custom_call.1
= control target key start
LH: loop header
LB: loop body
LE: loop exit
PB: predicated region body
PF: predicated region fallthrough
CT: control target
= control target key end

     0   :  { %s1949_s0 = inlined_call_operand.hbm [shape: f32[64,71], index: 0, kind: input, shape index: {}]   ;;  %s1950_s1 = inlined_call_operand.hbm [shape: bf16[71,256], index: 1, kind: input, shape index: {}]   ;;  %s1951_s2 = inlined_call_operand.hbm [shape: f32[1,256], index: 2, kind: input, shape index: {}]   ;;  %s1952_s3 = inlined_call_operand.hbm [shape: bf16[256,128], index: 3, kind: input, shape index: {}]   ;;  %s1953_s4 = inlined_call_operand.vmem [shape: f32[1,128], index: 4, kind: input, shape index: {}]   ;;  %s1954_s5 = inlined_call_operand.hbm [shape: bf16[128,128], index: 5, kind: input, shape index: {}]   ;;  %s1955_s6 = inlined_call_operand.vmem [shape: f32[1,128], index: 6, kind: input, shape index: {}]   ;;  %s1956_s7 = inlined_call_operand.hbm [shape: bf16[128,128], index: 7, kind: input, shape index: {}]   ;;  %s1957_s8 = inlined_call_operand.vmem [shape: f32[1,128], index: 8, kind: input, shape index: {}]   ;;  %s1958_s9 = inlined_call_operand.hbm [shape: bf16[64,128], index: 9, kind: output, shape index: {}]  }
   0x1   :  { %1961 = sst [smem:[#allocation19_spill]] %s1950_s1 }
   0x2   :  { %1962 = sst [smem:[#allocation20_spill]] %s1951_s2 }
   0x3   :  { %1963 = sst [smem:[#allocation21_spill]] %s1952_s3 }
   0x4   :  { %14 = vsyncpa [#allocation3], 0 }
   0x5   :  { %16 = vsyncpa [#allocation3 + $0x1], 0 }
   0x6   :  { %17 = vsyncpa [#allocation6], 0 }
   0x7   :  { %18 = vsyncpa [#allocation9], 0 }
   0x8   :  { %19 = vsyncpa [#allocation12], 0 }
   0x9   :  { %20 = vsyncpa [#allocation4], 0 }
   0xa   :  { %22 = vsyncpa [#allocation4 + $0x1], 0  ;;  %s1757_s30 = smov 0   ;;  %s1759_s10 = smov 0  }
   0xb   :  { %s1761_s11 = smov 0   ;;  %s1763_s12 = smov 0  }
   0xc LB: > { %s1964_s1 = sld [smem:[#allocation19_spill]]  ;;  %s1781_s16 = sadd.s32 4294967295, %s1693_s12   ;;  %s1693_s12 = sphi %s1763_s12, %s1979_s12   ;;  %s1689_s11 = sphi %s1761_s11, %s1978_s11   ;;  %s1685_s10 = sphi %s1759_s10, %s1977_s10   ;;  %s1681_s30 = sphi %s1757_s30, %s1976_s30  }
   0xd   : > { %p1072_p0 = scmp.ge.s32.totalorder %s1693_s12, 1  ;;  %p49_p1 = scmp.eq.s32.totalorder %s1781_s16, 0 }
   0xe   : > { %p253_p2 = scmp.lt.s32.totalorder %s1693_s12, 3  ;;  %s1695_s18 = smov [#allocation5]  }
   0xf   : > { %s266_s19 = sshll.u32 %s1695_s18, 4  ;;  %s1966_s3 = sld [smem:[#allocation21_spill]]  ;;  %s267_s19 = int_to_ptr.vmem [resolvable:$true] %s266_s19 }
  0x10   : > { %p1786_p3 = pnand %p1072_p0, %p253_p2  ;;  %s1696_s24 = smov [#allocation8]  }
  0x11   : > { %s292_s25 = sshll.u32 %s1696_s24, 4  ;;  %s1959_s26 = smov 128   ;;  %s293_s25 = int_to_ptr.vmem [resolvable:$true] %s292_s25 }
  0x12   : > { %s264_s15 = sshll.u32 %s1964_s1, 4  ;;  %p1352_p4 = pneg %p1786_p3  ;;  %s265_s15 = int_to_ptr.hbm [resolvable:$true] %s264_s15 }
  0x13   : > { %s1960_s27 = smov 8   ;;  %s1699_s28 = smov 64  }
  0x14   : > { %p1798_p6 = pnand %p1352_p4, %p49_p1  ;;  %s1700_s29 = smov 4  }
  0x15   : > { %s290_s22 = sshll.u32 %s1966_s3, 4  ;;  %s1968_s2 = sld [smem:[#allocation20_spill]]  ;;  %s291_s22 = int_to_ptr.hbm [resolvable:$true] %s290_s22 }
  0x16   : > { %1355 = dma.hbm_to_vmem [thread:$0]  (!%p1798_p6), %s265_s15, 1152, %s267_s19, [#allocation6], %s1959_s26, %s1959_s26, %s1960_s27  }
  0x17   : > { %1361 = dma.hbm_to_vmem [thread:$0]  (!%p1798_p6), %s291_s22, 2048, %s293_s25, [#allocation9], %s1699_s28, %s1699_s28, %s1700_s29  }
  0x18   : > { %s1701_s20 = smov [#allocation7]   ;;  %s307_s15 = sshll.u32 %s1954_s5, 4  ;;  %s308_s15 = int_to_ptr.hbm [resolvable:$true] %s307_s15 }
  0x19   : > { %s281_s21 = sshll.u32 %s1701_s20, 4  ;;  %s1702_s19 = smov [#allocation10]   ;;  %s282_s21 = int_to_ptr.vmem [resolvable:$true] %s281_s21 }
  0x1a   : > { %s309_s22 = sshll.u32 %s1702_s19, 4  ;;  %s324_s14 = sshll.u32 %s1956_s7, 4  ;;  %s310_s22 = int_to_ptr.vmem [resolvable:$true] %s309_s22  ;;  %s325_s14 = int_to_ptr.hbm [resolvable:$true] %s324_s14 }
  0x1b   : > { %s279_s18 = sshll.u32 %s1968_s2, 4  ;;  %s1703_s1 = smov [#allocation11]   ;;  %s280_s18 = int_to_ptr.hbm [resolvable:$true] %s279_s18 }
  0x1c   : > { %1358 = dma.hbm_to_vmem [thread:$0]  (!%p1798_p6), %s280_s18, 32, %s282_s21, [#allocation6]  }
  0x1d   : > { %1364 = dma.hbm_to_vmem [thread:$0]  (!%p1798_p6), %s308_s15, 1024, %s310_s22, [#allocation9], %s1699_s28, %s1699_s28, %s1700_s29  }
  0x1e   : > { %s326_s18 = sshll.u32 %s1703_s1, 4  ;;  %s1071_s20 = sadd.s32 4294967294, %s1693_s12   ;;  %s327_s18 = int_to_ptr.vmem [resolvable:$true] %s326_s18 }
  0x1f   : > { %1367 = dma.hbm_to_vmem [thread:$0]  (!%p1798_p6), %s325_s14, 1024, %s327_s18, [#allocation12], %s1699_s28, %s1699_s28, %s1700_s29  }
  0x20   : > { %s1826_s21 = sadd.s32 1, %s1693_s12   ;;  %s35_s24 = sadd.s32 1, %s1689_s11 }
  0x21   : > { %s32_s19 = ssub.s32 %s1693_s12, %s1826_s21  ;;  %p42_p7 = scmp.ne.s32.totalorder %s1689_s11, %s1685_s10 }
  0x22   : > { %p33_p8 = scmp.eq.s32.totalorder %s32_s19, 0  ;;  %p43_p9 = scmp.eq.s32.totalorder %s1693_s12, 0 }
  0x23   : > { %p48_p10 = scmp.ne.s32.totalorder %s1685_s10, %s1681_s30  ;;  %p240_p11 = scmp.eq.s32.totalorder %s1781_s16, 1 }
  0x24   : > { %s1838_s15 = scalar_select %p33_p8, %s1689_s11, %s35_s24  }
  0x25   : > { %p1842_p12 = por %p49_p1, %p48_p10  ;;  %p1846_p13 = por %p240_p11, %p42_p7 }
  0x26   : > { %p246_p0 = scmp.eq.s32.totalorder %s1071_s20, 1  ;;  %p44_p2 = por %p43_p9, %p42_p7 }
  0x27   : > { %s343_s29 = sand.u32 1, %s1689_s11   ;;  %p1381_p6 = scmp.lt.s32.totalorder %s1693_s12, 2 }
  0x28   : > { %p1851_p4 = por %p246_p0, %p48_p10  ;;  %s1079_s25 = sshll.u32 %s343_s29, 5 }
  0x29   : > { %s1259_s13 = sshll.u32 %s1693_s12, 5  ;;  %s347_s19 = scalar_lea.vmem [#allocation2], %s1079_s25 }
  0x2a   : > { %s352_s18 = scalar_lea.hbm %s1949_s0, %s1259_s13  ;;  %s355_s26 = sshll.u32 %s347_s19, 4  ;;  %s356_s26 = int_to_ptr.vmem [resolvable:$true] %s355_s26 }
  0x2b   : > { %s353_s24 = sshll.u32 %s352_s18, 4  ;;  %p1860_p8 = pnand %p1381_p6, %p44_p2  ;;  %s354_s24 = int_to_ptr.hbm [resolvable:$true] %s353_s24 }
  0x2c   : > { %s344_s27 = scalar_lea.sflag [#allocation3], %s343_s29  ;;  %s1585_s2 = sshra.s32 %s354_s24, 4  ;;  %s1586_s2 = int_to_ptr.hbm [resolvable:$true] %s1585_s2 }
  0x2d   : > { %s1587_s3 = scalar_lea.hbm %s1586_s2, 32  ;;  %p1589_p9 = pneg %p1860_p8 }
  0x2e   : > { %p1588_p7 = scmp.ne.s32.totalorder %s1586_s2, %s1587_s3  ;;  %s1592_s25 = scalar_lea.hbm %s1949_s0, 64 }
  0x2f   : > { %p1593_p0 = scmp.lt.s32.totalorder %s1586_s2, %s1949_s0  ;;  %p1594_p2 = scmp.lt.s32.totalorder %s1592_s25, %s1587_s3 }
  0x30   : > { %p1590_p10 = pnand %p1589_p9, %p1588_p7 }
  0x31   : > { %p1595_p6 = por %p1594_p2, %p1593_p0 }
  0x32   : > { %p1591_p11 = pneg %p1590_p10 }
  0x34   : > { %p1596_p5 = pnand %p1595_p6, %p1591_p11 }
  0x36   : > { %1599 = shalt.err (!%p1596_p5)
}
  0x37   : > { %s1973_s29 = smov 8   ;;  %s1974_s19 = smov 128  }
  0x38   : > { %1371 = dma.hbm_to_vmem [thread:$0]  (!%p1860_p8), %s354_s24, 512, %s356_s26, %s344_s27, %s1974_s19, %s1974_s19, %s1973_s29  }
  0x39   : > { %367 = sbr.rel (%p1786_p3) target bundleno = 693 (0x2b5), region = 56  ;;  %s1880_s13 = sand.u32 (!%p1786_p3), 1, %s1685_s10  }
  0x3a   : > { %s1083_s2 = sshll.u32 (!%p1786_p3), %s1880_s13, 5  ;;  %s370_s3 = scalar_lea.sflag (!%p1786_p3), [#allocation3], %s1880_s13 }
  0x3b   : > { %s1884_s14 = scalar_lea.vmem (!%p1786_p3), [#allocation2], %s1083_s2 }
  0x3e   : > { %1660 = dma.done.wait (%p1842_p12), %s370_s3, 512  }
  0x3f   : > { %1662 = vsyncadd (%p1842_p12), %s370_s3, 4294966784 }
  0x40   : > { %1664 = dma.done.wait (%p49_p1), [#allocation6], 1184  }
  0x41   : > { %1666 = vsyncadd (%p49_p1), [#allocation6], 4294966112 }
  0x42   : > { %1668 = dma.done.wait (%p49_p1), [#allocation9], 3072  }
  0x43   : > { %1670 = vsyncadd (%p49_p1), [#allocation9], 4294964224 }
  0x44   : > { %1672 = dma.done.wait (%p49_p1), [#allocation12], 1024  }
  0x45   : > { %1674 = vsyncadd (%p49_p1), [#allocation12], 4294966272  ;;  %vm510_vm0 = vcmask 1042432   ;;  %vm511_vm1 = vcmask 1043456   ;;  %v1704_v0 = vmov 65535   ;;  %v451_v2 = vld [vmem:[#allocation5 + $0x40] sm:$0xff] }
  0x46   : > { %v512_v1 = vsel %vm510_vm0, 4294967295, %v1704_v0  ;;  %v483_v3 = vunpack.c.l.b16 %v451_v2  ;;  %v484_v4 = vunpack.c.h.b16 %v451_v2  ;;  %v1116_v8 = vld [vmem:[#allocation5 + $0x30] sm:$0xf]  ;;  %v1267_v9 = vld [vmem:[#allocation5 + $0x34] sm:$0xf0]  ;;  %v1275_v20 = vld [vmem:[#allocation8 + $0x38] sm:$0xff] }
  0x47   : > { %v513_v5 = vsel %vm511_vm1, %v512_v1, 0  ;;  %v1266_v10 = vld [vmem:[#allocation5 + $0x34] sm:$0xf]  ;;  %v1118_v11 = vld [vmem:[#allocation5 + $0x38] sm:$0xf0]  ;;  %v1117_v15 = vor.u32 %v1267_v9, %v1116_v8  ;;  %v1283_v21 = vld [vmem:[#allocation8 + $0x78] sm:$0xff]  ;;  %702 = vmatpush.bf16.msra.mxu2 %v1275_v20 }
  0x48   : > { %v493_v6 = vpack.c.b16 %v483_v3, %v483_v3  ;;  %v494_v7 = vpack.c.b16 %v484_v4, %v484_v4  ;;  %v1108_v14 = vld [vmem:[#allocation5 + $0x20] sm:$0xf]  ;;  %v1121_v16 = vor.u32 %v1266_v10, %v1118_v11  ;;  %v1265_v17 = vld [vmem:[#allocation5 + $0x24] sm:$0xf0]  ;;  %v1264_v18 = vld [vmem:[#allocation5 + $0x24] sm:$0xf]  ;;  %721 = vmatpush.bf16.msra.mxu3 %v1283_v21 }
  0x49   : > { %v1110_v19 = vld [vmem:[#allocation5 + $0x28] sm:$0xf0]  ;;  %v1109_v22 = vor.u32 %v1265_v17, %v1108_v14  ;;  %v1100_v24 = vld [vmem:[#allocation5 + $0x10] sm:$0xf]  ;;  %v1263_v25 = vld [vmem:[#allocation5 + $0x14] sm:$0xf0] }
  0x4a   : > { %v515_v12 = vand.u32 %v513_v5, %v493_v6  ;;  %v518_v13 = vand.u32 %v513_v5, %v494_v7  ;;  %v1113_v23 = vor.u32 %v1264_v18, %v1110_v19  ;;  %v1262_v26 = vld [vmem:[#allocation5 + $0x14] sm:$0xf]  ;;  %v1102_v27 = vld [vmem:[#allocation5 + $0x18] sm:$0xf0]  ;;  %v1101_v30 = vor.u32 %v1263_v25, %v1100_v24  ;;  %v1092_v32 = vld [vmem:[#allocation5] sm:$0xf] }
  0x4b   : > { %v1274_v28 = vld [vmem:[#allocation8 + $0x30] sm:$0xff]  ;;  %v1105_v31 = vor.u32 %v1262_v26, %v1102_v27  ;;  %v1261_v33 = vld [vmem:[#allocation5 + $0x4] sm:$0xf0]  ;;  %v1260_v34 = vld [vmem:[#allocation5 + $0x4] sm:$0xf]  ;;  %vm503_vm2 = vcmask 580608  }
  0x4c   : > { %523 = vmatpush.bf16.msra.mxu0 %v515_v12  ;;  %542 = vmatpush.bf16.msra.mxu1 %v518_v13  ;;  %v1282_v29 = vld [vmem:[#allocation8 + $0x70] sm:$0xff]  ;;  %v1094_v35 = vld [vmem:[#allocation5 + $0x8] sm:$0xf0]  ;;  %v1273_v36 = vld [vmem:[#allocation8 + $0x28] sm:$0xff]  ;;  %v1093_v38 = vor.u32 %v1261_v33, %v1092_v32  ;;  %s1089_s25 = sshll.u32 %s1880_s13, 4  ;;  %s1300_s18 = sshll.u32 %s1781_s16, 4 }
  0x4d   : > { %703 = vmatpush.bf16.msra.mxu2 %v1274_v28  ;;  %722 = vmatpush.bf16.msra.mxu3 %v1282_v29  ;;  %v1281_v37 = vld [vmem:[#allocation8 + $0x68] sm:$0xff]  ;;  %v1097_v39 = vor.u32 %v1260_v34, %v1094_v35  ;;  %v437_v40 = vld [vmem:[%s1884_s14] sm:$0xff]  ;;  %v438_v41 = vld [vmem:[%s1884_s14 + $0x8] sm:$0xff]  ;;  %s433_s1 = scalar_lea.vmem [#allocation13], %s1089_s25  ;;  %s946_s2 = scalar_lea.hbm %s1958_s9, %s1300_s18 }
  0x4e   : > { %v1272_v42 = vld [vmem:[#allocation8 + $0x20] sm:$0xff]  ;;  %v441_v44 = vpack.c.bf16 %v438_v41, %v437_v40  ;;  %v440_v46 = vld [vmem:[%s1884_s14 + $0x18] sm:$0xff]  ;;  %v1271_v48 = vld [vmem:[#allocation8 + $0x18] sm:$0xff]  ;;  %s947_s3 = sshll.u32 %s433_s1, 4  ;;  %s935_s17 = scalar_lea.sflag [#allocation4], %s1880_s13  ;;  %s948_s3 = int_to_ptr.vmem [resolvable:$true] %s947_s3 }
  0x4f   : > { %v1280_v43 = vld [vmem:[#allocation8 + $0x60] sm:$0xff]  ;;  %v1279_v49 = vld [vmem:[#allocation8 + $0x58] sm:$0xff]  ;;  %v1270_v50 = vld [vmem:[#allocation8 + $0x10] sm:$0xff]  ;;  %s1635_s24 = scalar_lea.hbm %s1958_s9, 32 }
  0x50   : > { %524 = vmatpush.bf16.msra.mxu0 %v1117_v15  ;;  %543 = vmatpush.bf16.msra.mxu1 %v1121_v16  ;;  %v439_v45 = vld [vmem:[%s1884_s14 + $0x10] sm:$0xff]  ;;  %v1278_v51 = vld [vmem:[#allocation8 + $0x50] sm:$0xff]  ;;  %v1291_v56 = vld [vmem:[#allocation10 + $0x38] sm:$0xff]  ;;  %s949_s14 = sshll.u32 %s946_s2, 4  ;;  %s950_s14 = int_to_ptr.hbm [resolvable:$true] %s949_s14 }
  0x51   : > { %704 = vmatpush.bf16.msra.mxu2 %v1273_v36  ;;  %723 = vmatpush.bf16.msra.mxu3 %v1281_v37  ;;  %v442_v47 = vpack.c.bf16 %v440_v46, %v439_v45  ;;  %v1269_v52 = vld [vmem:[#allocation8 + $0x8] sm:$0xff]  ;;  %v1268_v54 = vld [vmem:[#allocation8] sm:$0xff]  ;;  %v452_v57 = vld [vmem:[#allocation7] sm:$0x3]  ;;  %s1629_s26 = sshra.s32 %s950_s14, 4  ;;  %s1630_s26 = int_to_ptr.hbm [resolvable:$true] %s1629_s26 }
  0x52   : > { %v1277_v53 = vld [vmem:[#allocation8 + $0x48] sm:$0xff]  ;;  %v1276_v55 = vld [vmem:[#allocation8 + $0x40] sm:$0xff]  ;;  %v1290_v60 = vld [vmem:[#allocation10 + $0x30] sm:$0xff]  ;;  %v454_v61 = vperm.slane %v452_v57, 0  ;;  %v455_v62 = vperm.slane %v452_v57, 1  ;;  %s1631_s27 = scalar_lea.hbm %s1630_s26, 16  ;;  %p1636_p12 = scmp.lt.s32.totalorder %s1630_s26, %s1958_s9 }
  0x53   : > { %v1289_v63 = vld [vmem:[#allocation10 + $0x28] sm:$0xff]  ;;  %v1288_v6 = vld [vmem:[#allocation10 + $0x20] sm:$0xff]  ;;  %v1287_v27 = vld [vmem:[#allocation10 + $0x18] sm:$0xff]  ;;  %p1632_p1 = scmp.ne.s32.totalorder %s1630_s26, %s1631_s27  ;;  %p1637_p8 = scmp.lt.s32.totalorder %s1635_s24, %s1631_s27 }
  0x54   : > { %525 = vmatpush.bf16.msra.mxu0 %v1109_v22  ;;  %544 = vmatpush.bf16.msra.mxu1 %v1113_v23  ;;  %v1286_v28 = vld [vmem:[#allocation10 + $0x10] sm:$0xff]  ;;  %v1285_v29 = vld [vmem:[#allocation10 + $0x8] sm:$0xff]  ;;  %v1299_v34 = vld [vmem:[#allocation11 + $0x38] sm:$0xff] }
  0x55   : > { %705 = vmatpush.bf16.msra.mxu2 %v1272_v42  ;;  %724 = vmatpush.bf16.msra.mxu3 %v1280_v43  ;;  %v1432_v33 = vld [vmem:[%s1953_s4] ss:$0 sm:$0xff]  ;;  %v1297_v37 = vld [vmem:[#allocation11 + $0x28] sm:$0xff]  ;;  %v1296_v43 = vld [vmem:[#allocation11 + $0x20] sm:$0xff]  ;;  %p1633_p3 = pnand %p1632_p1, %p1846_p13  ;;  %p1638_p7 = por %p1637_p8, %p1636_p12 }
  0x56   : > { %v1298_v35 = vld [vmem:[#allocation11 + $0x30] sm:$0xff] }
  0x57   : > { %p1634_p5 = pneg %p1633_p3 }
  0x58   : > { %526 = vmatpush.bf16.msra.mxu0 %v1101_v30  ;;  %545 = vmatpush.bf16.msra.mxu1 %v1105_v31  ;;  %v1284_v30 = vld [vmem:[#allocation10] sm:$0xff] }
  0x59   : > { %706 = vmatpush.bf16.msra.mxu2 %v1271_v48  ;;  %725 = vmatpush.bf16.msra.mxu3 %v1279_v49  ;;  %p1639_p9 = pnand %p1638_p7, %p1634_p5 }
  0x5c   : > { %527 = vmatpush.bf16.msra.mxu0 %v1093_v38  ;;  %546 = vmatpush.bf16.msra.mxu1 %v1097_v39 }
  0x5d   : > { %707 = vmatpush.bf16.msra.mxu2 %v1270_v50  ;;  %726 = vmatpush.bf16.msra.mxu3 %v1278_v51 }
  0x5f   : > { %1122 = vmatmul.msk.bf16.vlgmr.msra.gmra.mxu0 %vm503_vm2, %v441_v44  ;;  %1124 = vmatmul.msk.bf16.vlgmr.msra.gmra.mxu1 %vm503_vm2, %v441_v44 }
  0x60   : > { %814 = vmatpush.bf16.msrb.mxu0 %v1291_v56  ;;  %907 = vmatpush.bf16.msrb.mxu1 %v1299_v34 }
  0x61   : > { %708 = vmatpush.bf16.msra.mxu2 %v1269_v52  ;;  %727 = vmatpush.bf16.msra.mxu3 %v1277_v53 }
  0x64   : > { %815 = vmatpush.bf16.msrb.mxu0 %v1290_v60  ;;  %908 = vmatpush.bf16.msrb.mxu1 %v1298_v35 }
  0x65   : > { %709 = vmatpush.bf16.msra.mxu2 %v1268_v54  ;;  %728 = vmatpush.bf16.msra.mxu3 %v1276_v55 }
  0x68   : > { %816 = vmatpush.bf16.msrb.mxu0 %v1289_v63  ;;  %909 = vmatpush.bf16.msrb.mxu1 %v1297_v37 }
  0x69   : > { %1312 = vmatpush.bf16.msrb.mxu2 %v1291_v56  ;;  %1320 = vmatpush.bf16.msrb.mxu3 %v1299_v34 }
  0x6c   : > { %817 = vmatpush.bf16.msrb.mxu0 %v1288_v6  ;;  %910 = vmatpush.bf16.msrb.mxu1 %v1296_v43 }
  0x6d   : > { %1313 = vmatpush.bf16.msrb.mxu2 %v1290_v60  ;;  %1321 = vmatpush.bf16.msrb.mxu3 %v1298_v35  ;;  %v1293_v60 = vld [vmem:[#allocation11 + $0x8] sm:$0xff] }
  0x6f   : > { %1123 = vmatmul.msk.bf16.gmra.mxu0 %vm503_vm2, %v442_v47  ;;  %1125 = vmatmul.msk.bf16.gmra.mxu1 %vm503_vm2, %v442_v47 }
  0x70   : > { %818 = vmatpush.bf16.msrb.mxu0 %v1287_v27 }
  0x71   : > { %1314 = vmatpush.bf16.msrb.mxu2 %v1289_v63  ;;  %1322 = vmatpush.bf16.msrb.mxu3 %v1297_v37  ;;  %v1433_v63 = vld [vmem:[%s1955_s6] ss:$0 sm:$0xff] }
  0x74   : > { %819 = vmatpush.bf16.msrb.mxu0 %v1286_v28 }
  0x75   : > { %1315 = vmatpush.bf16.msrb.mxu2 %v1288_v6  ;;  %1323 = vmatpush.bf16.msrb.mxu3 %v1296_v43 }
  0x78   : > { %820 = vmatpush.bf16.msrb.mxu0 %v1285_v29 }
  0x79   : > { %1316 = vmatpush.bf16.msrb.mxu2 %v1287_v27 }
  0x7c   : > { %821 = vmatpush.bf16.msrb.mxu0 %v1284_v30 }
  0x7d   : > { %1317 = vmatpush.bf16.msrb.mxu2 %v1286_v28 }
  0x81   : > { %1318 = vmatpush.bf16.msrb.mxu2 %v1285_v29 }
  0x85   : > { %1319 = vmatpush.bf16.msrb.mxu2 %v1284_v30 }
  0xdc   : > { %v529_v58 = vpop.f32.mrf.mxu0  ;;  %v548_v59 = vpop.f32.mrf.mxu1 }
  0xdd   : > { %v530_v0 = vadd.f32 %v529_v58, %v454_v61  ;;  %v549_v1 = vadd.f32 %v548_v59, %v455_v62  ;;  %v1295_v58 = vld [vmem:[#allocation11 + $0x18] sm:$0xff]  ;;  %v1294_v59 = vld [vmem:[#allocation11 + $0x10] sm:$0xff] }
  0xde   : > { %911 = vmatpush.bf16.msrb.mxu1 %v1295_v58  ;;  %1324 = vmatpush.bf16.msrb.mxu3 %v1295_v58 }
  0xdf   : > { %v558_v7 = vmax.f32 %v530_v0, 0.0  ;;  %v559_v8 = vmax.f32 %v549_v1, 0.0 }
  0xe2   : > { %912 = vmatpush.bf16.msrb.mxu1 %v1294_v59  ;;  %1325 = vmatpush.bf16.msrb.mxu3 %v1294_v59 }
  0xe4   : > { %v531_v2 = vpop.f32.mrf.mxu0  ;;  %v550_v3 = vpop.f32.mrf.mxu1 }
  0xe5   : > { %v532_v4 = vadd.f32 %v531_v2, %v454_v61  ;;  %v551_v5 = vadd.f32 %v550_v3, %v455_v62 }
  0xe6   : > { %913 = vmatpush.bf16.msrb.mxu1 %v1293_v60  ;;  %1326 = vmatpush.bf16.msrb.mxu3 %v1293_v60 }
  0xe7   : > { %v560_v9 = vmax.f32 %v532_v4, 0.0  ;;  %v561_v10 = vmax.f32 %v551_v5, 0.0 }
  0xe9   : > { %v566_v11 = vpack.c.bf16 %v560_v9, %v558_v7  ;;  %v567_v12 = vpack.c.bf16 %v561_v10, %v559_v8 }
  0xeb   : > { %710 = vmatmul.bf16.vlgmr.msra.gmra.mxu2 %v566_v11  ;;  %729 = vmatmul.bf16.vlgmr.msra.gmra.mxu3 %v567_v12 }
  0xec   : > { %v534_v13 = vpop.f32.mrf.mxu0  ;;  %v553_v14 = vpop.f32.mrf.mxu1 }
  0xed   : > { %v535_v15 = vadd.f32 %v534_v13, %v454_v61  ;;  %v554_v16 = vadd.f32 %v553_v14, %v455_v62  ;;  %v1434_v14 = vld [vmem:[%s1957_s8] ss:$0 sm:$0xff] }
  0xef   : > { %v562_v21 = vmax.f32 %v535_v15, 0.0  ;;  %v563_v22 = vmax.f32 %v554_v16, 0.0 }
  0xf4   : > { %v536_v17 = vpop.f32.mrf.mxu0  ;;  %v555_v18 = vpop.f32.mrf.mxu1 }
  0xf5   : > { %v537_v19 = vadd.f32 %v536_v17, %v454_v61  ;;  %v556_v20 = vadd.f32 %v555_v18, %v455_v62  ;;  %v1292_v61 = vld [vmem:[#allocation11] sm:$0xff] }
  0xf6   : > { %914 = vmatpush.bf16.msrb.mxu1 %v1292_v61  ;;  %1327 = vmatpush.bf16.msrb.mxu3 %v1292_v61 }
  0xf7   : > { %v564_v23 = vmax.f32 %v537_v19, 0.0  ;;  %v565_v24 = vmax.f32 %v556_v20, 0.0 }
  0xf9   : > { %v568_v25 = vpack.c.bf16 %v564_v23, %v562_v21  ;;  %v569_v26 = vpack.c.bf16 %v565_v24, %v563_v22 }
  0xfb   : > { %715 = vmatmul.bf16.gmra.mxu2 %v568_v25  ;;  %734 = vmatmul.bf16.gmra.mxu3 %v569_v26 }
 0x16e   : > { %v711_v31 = vpop.f32.mrf.mxu2  ;;  %v730_v32 = vpop.f32.mrf.mxu3 }
 0x16f   : > { %v712_v36 = vadd.f32 %v1432_v33, %v711_v31 }
 0x171   : > { %v731_v40 = vadd.f32 %v730_v32, %v712_v36 }
 0x173   : > { %v740_v44 = vmax.f32 %v731_v40, 0.0 }
 0x176   : > { %v713_v38 = vpop.f32.mrf.mxu2  ;;  %v732_v39 = vpop.f32.mrf.mxu3 }
 0x177   : > { %v714_v41 = vadd.f32 %v1432_v33, %v713_v38 }
 0x179   : > { %v733_v42 = vadd.f32 %v732_v39, %v714_v41 }
 0x17b   : > { %v741_v45 = vmax.f32 %v733_v42, 0.0 }
 0x17d   : > { %v744_v46 = vpack.c.bf16 %v741_v45, %v740_v44 }
 0x17e   : > { %v716_v47 = vpop.f32.mrf.mxu2  ;;  %v735_v48 = vpop.f32.mrf.mxu3 }
 0x17f   : > { %822 = vmatmul.bf16.vlgmr.msrb.gmra.mxu0 %v744_v46  ;;  %v717_v49 = vadd.f32 %v1432_v33, %v716_v47 }
 0x181   : > { %v736_v51 = vadd.f32 %v735_v48, %v717_v49 }
 0x183   : > { %v742_v55 = vmax.f32 %v736_v51, 0.0 }
 0x186   : > { %v718_v50 = vpop.f32.mrf.mxu2  ;;  %v737_v53 = vpop.f32.mrf.mxu3 }
 0x187   : > { %v719_v52 = vadd.f32 %v1432_v33, %v718_v50 }
 0x189   : > { %v738_v54 = vadd.f32 %v737_v53, %v719_v52 }
 0x18b   : > { %v743_v56 = vmax.f32 %v738_v54, 0.0 }
 0x18d   : > { %v745_v57 = vpack.c.bf16 %v743_v56, %v742_v55 }
 0x18f   : > { %827 = vmatmul.bf16.vlgmr.msrb.gmra.mxu2 %v745_v57 }
 0x1fc   : > { %v823_v62 = vpop.f32.mrf.mxu0 }
 0x1fd   : > { %v824_v0 = vadd.f32 %v1433_v63, %v823_v62 }
 0x1ff   : > { %v833_v3 = vmax.f32 %v824_v0, 0.0 }
 0x204   : > { %v825_v1 = vpop.f32.mrf.mxu0 }
 0x205   : > { %v826_v2 = vadd.f32 %v1433_v63, %v825_v1 }
 0x207   : > { %v834_v4 = vmax.f32 %v826_v2, 0.0 }
 0x209   : > { %v837_v5 = vpack.c.bf16 %v834_v4, %v833_v3 }
 0x20b   : > { %915 = vmatmul.bf16.vlgmr.msrb.gmra.mxu1 %v837_v5 }
 0x212   : > { %v828_v6 = vpop.f32.mrf.mxu2 }
 0x213   : > { %v829_v7 = vadd.f32 %v1433_v63, %v828_v6 }
 0x215   : > { %v835_v10 = vmax.f32 %v829_v7, 0.0 }
 0x21a   : > { %v830_v8 = vpop.f32.mrf.mxu2 }
 0x21b   : > { %v831_v9 = vadd.f32 %v1433_v63, %v830_v8 }
 0x21d   : > { %v836_v11 = vmax.f32 %v831_v9, 0.0 }
 0x21f   : > { %v838_v12 = vpack.c.bf16 %v836_v11, %v835_v10 }
 0x221   : > { %920 = vmatmul.bf16.vlgmr.msrb.gmra.mxu3 %v838_v12 }
 0x288   : > { %v916_v13 = vpop.f32.mrf.mxu1 }
 0x289   : > { %v917_v16 = vadd.f32 %v1434_v14, %v916_v13 }
 0x290   : > { %v918_v15 = vpop.f32.mrf.mxu1 }
 0x291   : > { %v919_v17 = vadd.f32 %v1434_v14, %v918_v15 }
 0x293   : > { %v1304_v18 = vpack.c.bf16 %v919_v17, %v917_v16 }
 0x295   : > { %1305 = vst [vmem:[%s433_s1] sm:$0xff] %v1304_v18  }
 0x2a4   : > { %v921_v19 = vpop.f32.mrf.mxu3 }
 0x2a5   : > { %v922_v21 = vadd.f32 %v1434_v14, %v921_v19 }
 0x2ac   : > { %v923_v20 = vpop.f32.mrf.mxu3 }
 0x2ad   : > { %v924_v22 = vadd.f32 %v1434_v14, %v923_v20 }
 0x2af   : > { %v1309_v23 = vpack.c.bf16 %v924_v22, %v922_v21 }
 0x2b1   : > { %1311 = vst [vmem:[%s433_s1 + $0x8] sm:$0xff] %v1309_v23  }
 0x2b2   : > { %1642 = shalt.err (!%p1639_p9)
}
 0x2b3   : > { %s1705_s13 = smov 64   ;;  %s1706_s1 = smov 4  }
 0x2b4   : > { %1350 = dma.vmem_to_hbm [thread:$0]  (%p1846_p13), %s948_s3, 256, %s950_s14, %s935_s17, %s1705_s13, %s1705_s13, %s1706_s1  }
 0x2b5 PF: > { %s964_s18 = sand.u32 1, %s1681_s30   ;;  %p1975_p10 = scmp.ge.s32.totalorder %s1693_s12, 2 }
 0x2b6   : > { %s965_s29 = scalar_lea.sflag [#allocation4], %s964_s18 }
 0x2b7   : > { %p1373_p11 = pnand %p1975_p10, %p1851_p4 }
 0x2b9   : > { %p1374_p0 = pneg %p1373_p11 }
 0x2bb   : > { %1676 = dma.done.wait (%p1374_p0), %s965_s29, 256  }
 0x2bc   : > { %1678 = vsyncadd (%p1374_p0), %s965_s29, 4294967040  ;;  %p25_p2 = scmp.ge.s32.totalorder %s1826_s21, 4   ;;  %s1976_s30 = smov %s1685_s10 }
 0x2bd   : > { %s1977_s10 = smov %s1689_s11  ;;  %s1978_s11 = smov %s1838_s15 }
 0x2be   : > { %s1979_s12 = smov %s1826_s21  ;;  %27 = sbr.rel (!%p25_p2) target bundleno = 12 (0xc), region = 121 }
 0x2c3   :  { %971 = vsyncpa [#allocation3], 1 }
 0x2c4   :  { %973 = vsyncpa [#allocation3 + $0x1], 1 }
 0x2c5   :  { %974 = vsyncpa [#allocation6], 1 }
 0x2c6   :  { %975 = vsyncpa [#allocation9], 1 }
 0x2c7   :  { %976 = vsyncpa [#allocation12], 1 }
 0x2c8   :  { %977 = vsyncpa [#allocation4], 1 }
 0x2c9   :  { %979 = vsyncpa [#allocation4 + $0x1], 1 }

</bundles_post_ra>
